<compile_context>
chip_gen: v6e
topology: v6e:2x2x1
jax: 0.10.0
libtpu: 0.0.40
codegen_flags: <defaults>
</compile_context>

<pallas_src>
import jax
import jax.numpy as jnp
from jax.experimental import pallas as pl
from jax.experimental.pallas import tpu as pltpu

GROUP_SIZE = 128
QMIN = 0.0
QMAX = 15.0


def _round_up(n, m):
    return ((n + m - 1) // m) * m


def _fake_quant_kernel(x_ref, o_ref):
    # x_ref / o_ref: (tile_rows, GROUP_SIZE) -- one row per quantization group.
    x = x_ref[...].astype(jnp.float32)

    max_val = jnp.max(x, axis=-1, keepdims=True)
    min_val = jnp.min(x, axis=-1, keepdims=True)

    # scales = clamp(max - min, min=1e-5) / (qmax - qmin)
    scales = jnp.maximum(max_val - min_val, 1e-5) * (1.0 / (QMAX - QMIN))

    # Hoisted exact reciprocal: per-row (tile_rows, 1) vector only.
    # (exact division here; approx reciprocal could flip round() at .5 boundaries)
    inv_scales = 1.0 / scales

    # zeros = clamp(qmin - round(min / scales), qmin, qmax); qmin == 0
    zeros = jnp.clip(QMIN - jnp.round(min_val * inv_scales), QMIN, QMAX)

    # quantize-dequantize (per-element mul instead of divide)
    q = jnp.clip(jnp.round(x * inv_scales) + zeros, QMIN, QMAX)
    o_ref[...] = ((q - zeros) * scales).astype(o_ref.dtype)


def int4_weight_only_fake_quant(x, *, tile_rows=2048):
    ori_shape = x.shape
    total = x.size
    assert total % GROUP_SIZE == 0, "total elements must be divisible by group_size=128"
    num_groups = total // GROUP_SIZE
    x2d = x.reshape(num_groups, GROUP_SIZE)

    # Row tile: multiple of 8 (sublane), capped at `tile_rows` (1 MiB f32 block,
    # ~4 MiB with double-buffered input+output -> safe on v5e/v6e/v7x scoped VMEM),
    # but never larger than the (rounded-up) number of groups.
    tile = min(tile_rows, _round_up(num_groups, 8))
    tile = max(8, _round_up(tile, 8))

    # Pad the group dimension up to a multiple of the tile instead of collapsing
    # to a single whole-array block. Padded rows are all-zero -> scale=1e-5/15,
    # zeros=0, output 0; they are sliced off below.
    padded_rows = _round_up(num_groups, tile)
    if padded_rows != num_groups:
        x2d = jnp.pad(x2d, ((0, padded_rows - num_groups), (0, 0)))

    grid = (padded_rows // tile,)

    bytes_accessed = 2 * padded_rows * GROUP_SIZE * x2d.dtype.itemsize
    out2d = pl.pallas_call(
        _fake_quant_kernel,
        out_shape=jax.ShapeDtypeStruct((padded_rows, GROUP_SIZE), x.dtype),
        grid=grid,
        in_specs=[pl.BlockSpec((tile, GROUP_SIZE), lambda i: (i, 0))],
        out_specs=pl.BlockSpec((tile, GROUP_SIZE), lambda i: (i, 0)),
        input_output_aliases={0: 0},
        compiler_params=pltpu.CompilerParams(
            dimension_semantics=("parallel",),
        ),
        cost_estimate=pl.CostEstimate(
            flops=10 * padded_rows * GROUP_SIZE,
            transcendentals=0,
            bytes_accessed=bytes_accessed,
        ),
    )(x2d)

    if padded_rows != num_groups:
        out2d = out2d[:num_groups]
    return out2d.reshape(ori_shape)


def _reference_fake_quant(x):
    """Pure-JAX reference mirroring the PyTorch forward."""
    ori_shape = x.shape
    x = x.reshape(-1, GROUP_SIZE)
    max_val = jnp.max(x, axis=-1, keepdims=True)
    min_val = jnp.min(x, axis=-1, keepdims=True)
    scales = jnp.maximum(max_val - min_val, 1e-5) / (QMAX - QMIN)
    zeros = jnp.clip(QMIN - jnp.round(min_val / scales), QMIN, QMAX)
    xq = jnp.clip(jnp.round(x / scales) + zeros, QMIN, QMAX)
    out = (xq - zeros) * scales
    return out.reshape(ori_shape)


if __name__ == "__main__":
    key = jax.random.PRNGKey(0)
    # Small NCHW-style input: 2*4*16*16 = 2048 elements = 16 groups of 128.
    x = jax.random.normal(key, (2, 4, 16, 16), dtype=jnp.float32)

    out = int4_weight_only_fake_quant(x)
    out = jax.block_until_ready(out)

    ref = _reference_fake_quant(x)
    assert out.shape == x.shape and out.dtype == x.dtype
    assert jnp.allclose(out, ref, atol=1e-5, rtol=1e-5), "mismatch vs reference"

    # Also exercise a non-divisible (padded) group count and a larger tile path.
    x2 = jax.random.normal(jax.random.PRNGKey(1), (24, 128), dtype=jnp.float32)  # 24 groups
    out2 = jax.block_until_ready(int4_weight_only_fake_quant(x2, tile_rows=16))
    ref2 = _reference_fake_quant(x2)
    assert jnp.allclose(out2, ref2, atol=1e-5, rtol=1e-5), "mismatch vs reference (padded path)"

    print("KERNEL_OK")
</pallas_src>

<mosaic_0001>
module attributes {stable_mosaic.version = 11 : i64} {
  func.func @_fake_quant_kernel(%arg0: i32, %arg1: memref<16x128xf32, #tpu.memory_space<vmem>>, %arg2: memref<16x128xf32, #tpu.memory_space<vmem>>) attributes {dimension_semantics = [#tpu.dimension_semantics<parallel>], iteration_bounds = array<i64: 1>, scalar_prefetch = 0 : i64, scratch_operands = 0 : i64, tpu.core_type = #tpu.core_type<tc>, window_params = [{transform_indices = @transform_0, window_bounds = array<i64: 16, 128>}, {transform_indices = @transform_1, window_bounds = array<i64: 16, 128>}]} {
    %c0 = arith.constant 0 : index
    %c0_0 = arith.constant 0 : index
    %0 = vector.load %arg1[%c0, %c0_0] : memref<16x128xf32, #tpu.memory_space<vmem>>, vector<16x128xf32>
    %cst = arith.constant dense<0xFF800000> : vector<16xf32>
    %1 = vector.multi_reduction <maximumf>, %0, %cst [1] : vector<16x128xf32> to vector<16xf32>
    %2 = vector.shape_cast %1 : vector<16xf32> to vector<16x1xf32>
    %cst_1 = arith.constant dense<0x7F800000> : vector<16xf32>
    %3 = vector.multi_reduction <minimumf>, %0, %cst_1 [1] : vector<16x128xf32> to vector<16xf32>
    %4 = vector.shape_cast %3 : vector<16xf32> to vector<16x1xf32>
    %5 = arith.subf %2, %4 : vector<16x1xf32>
    %cst_2 = arith.constant 9.99999974E-6 : f32
    %6 = vector.broadcast %cst_2 : f32 to vector<16x1xf32>
    %7 = arith.maximumf %5, %6 : vector<16x1xf32>
    %cst_3 = arith.constant 0.0666666701 : f32
    %8 = vector.broadcast %cst_3 : f32 to vector<16x1xf32>
    %9 = arith.mulf %7, %8 : vector<16x1xf32>
    %cst_4 = arith.constant 1.000000e+00 : f32
    %10 = vector.broadcast %cst_4 : f32 to vector<16x1xf32>
    %11 = arith.divf %10, %9 : vector<16x1xf32>
    %12 = arith.mulf %4, %11 : vector<16x1xf32>
    %13 = math.roundeven %12 : vector<16x1xf32>
    %cst_5 = arith.constant 0.000000e+00 : f32
    %14 = vector.broadcast %cst_5 : f32 to vector<16x1xf32>
    %15 = arith.subf %14, %13 : vector<16x1xf32>
    %cst_6 = arith.constant 0.000000e+00 : f32
    %cst_7 = arith.constant 1.500000e+01 : f32
    %16 = vector.broadcast %cst_6 : f32 to vector<16x1xf32>
    %17 = arith.maximumf %16, %15 : vector<16x1xf32>
    %18 = vector.broadcast %cst_7 : f32 to vector<16x1xf32>
    %19 = arith.minimumf %18, %17 : vector<16x1xf32>
    %20 = vector.broadcast %11 : vector<16x1xf32> to vector<16x128xf32>
    %21 = arith.mulf %0, %20 : vector<16x128xf32>
    %22 = math.roundeven %21 : vector<16x128xf32>
    %23 = vector.broadcast %19 : vector<16x1xf32> to vector<16x128xf32>
    %24 = arith.addf %22, %23 : vector<16x128xf32>
    %cst_8 = arith.constant 0.000000e+00 : f32
    %cst_9 = arith.constant 1.500000e+01 : f32
    %25 = vector.broadcast %cst_8 : f32 to vector<16x128xf32>
    %26 = arith.maximumf %25, %24 : vector<16x128xf32>
    %27 = vector.broadcast %cst_9 : f32 to vector<16x128xf32>
    %28 = arith.minimumf %27, %26 : vector<16x128xf32>
    %29 = vector.broadcast %19 : vector<16x1xf32> to vector<16x128xf32>
    %30 = arith.subf %28, %29 : vector<16x128xf32>
    %31 = vector.broadcast %9 : vector<16x1xf32> to vector<16x128xf32>
    %32 = arith.mulf %30, %31 : vector<16x128xf32>
    %c0_10 = arith.constant 0 : index
    %c0_11 = arith.constant 0 : index
    %33 = vector.load %arg2[%c0_10, %c0_11] : memref<16x128xf32, #tpu.memory_space<vmem>>, vector<16x128xf32>
    tpu.vector_store %arg2[%c0_10, %c0_11], %32 {strides = array<i32>} : memref<16x128xf32, #tpu.memory_space<vmem>>, vector<16x128xf32>,
    return
  }
  func.func @transform_0(%arg0: i32) -> (i32, i32) {
    %c0_i32 = arith.constant 0 : i32
    %c0_i32_0 = arith.constant 0 : i32
    return %arg0, %c0_i32 : i32, i32
  }
  func.func @transform_1(%arg0: i32) -> (i32, i32) {
    %c0_i32 = arith.constant 0 : i32
    %c0_i32_0 = arith.constant 0 : i32
    return %arg0, %c0_i32 : i32, i32
  }
}

</mosaic_0001>

<bundles_post_ra>
// kernel: tpu_custom_call.1
= control target key start
LH: loop header
LB: loop body
LE: loop exit
PB: predicated region body
PF: predicated region fallthrough
CT: control target
= control target key end

     0   :  { %6 = vsyncpa [#allocation3], 0  ;;  %s196_s0 = inlined_call_operand.hbm [shape: f32[16,128], index: 0, kind: input, shape index: {}, may-alias: {0,1}]   ;;  %s197_s1 = inlined_call_operand.hbm [shape: f32[16,128], index: 1, kind: output, shape index: {}, may-alias: {0,1}]  }
   0x1   :  { %7 = vsyncpa [#allocation4], 0  ;;  %s170_s6 = smov [#allocation2]  }
   0x2   :  { %s13_s7 = sshll.u32 %s170_s6, 4  ;;  %s14_s7 = int_to_ptr.vmem [resolvable:$true] %s13_s7 }
   0x3   :  { %s134_s8 = scalar_lea.vmem %s14_s7, 256  ;;  %p139_p1 = scmp.lt.s32.totalorder %s14_s7, %s14_s7 }
   0x4   :  { %p135_p0 = scmp.ne.s32.totalorder %s14_s7, %s134_s8  ;;  %p140_p2 = scmp.lt.s32.totalorder %s134_s8, %s134_s8 }
   0x6   :  { %p141_p3 = por %p140_p2, %p139_p1 }
   0x8   :  { %p142_p4 = pnand %p141_p3, %p135_p0 }
   0xa   :  { %145 = shalt.err (!%p142_p4)
}
   0xb   :  { %s171_s9 = smov 128   ;;  %s172_s10 = smov 8  }
   0xc   :  { %19 = dma.hbm_to_vmem [thread:$0]  %s196_s0, 256, %s14_s7, [#allocation3], %s171_s9, %s171_s9, %s172_s10  }
   0xd   :  { %166 = dma.done.wait [#allocation3], 256  }
   0xe   :  { %167 = vsyncadd [#allocation3], 4294967040  ;;  %v23_v0 = vld [vmem:[#allocation2] sm:$0xff]  ;;  %v24_v1 = vld [vmem:[#allocation2 + $0x8] sm:$0xff]  ;;  %s173_s0 = smov [#allocation5]  }
   0xf   :  { %29 = vmin.xlane.f32.xlu1 %v23_v0  ;;  %25 = vmax.xlane.f32.xlu0 %v23_v0  ;;  %s74_s13 = sshll.u32 %s173_s0, 4  ;;  %s75_s13 = int_to_ptr.vmem [resolvable:$true] %s74_s13 }
  0x10   :  { %s146_s14 = scalar_lea.vmem %s75_s13, 256  ;;  %p151_p6 = scmp.lt.s32.totalorder %s75_s13, %s75_s13 }
  0x11   :  { %p147_p5 = scmp.ne.s32.totalorder %s75_s13, %s146_s14  ;;  %p152_p7 = scmp.lt.s32.totalorder %s146_s14, %s146_s14 }
  0x13   :  { %31 = vmin.xlane.f32.xlu1 %v24_v1  ;;  %27 = vmax.xlane.f32.xlu0 %v24_v1  ;;  %p153_p8 = por %p152_p7, %p151_p6 }
  0x15   :  { %p154_p9 = pnand %p153_p8, %p147_p5 }
  0x98   :  { %v30_v2 = vpop.xlane.xlu1 %29  ;;  %v26_v3 = vpop.xlane.xlu0 %25 }
  0x99   :  { %v33_v4 = vsub.f32 %v26_v3, %v30_v2 }
  0x9b   :  { %v35_v5 = vmax.f32 %v33_v4, 1e-05 }
  0x9c   :  { %v32_v6 = vpop.xlane.xlu1 %31  ;;  %v28_v7 = vpop.xlane.xlu0 %27 }
  0x9d   :  { %v37_v8 = vmul.f32 0.06666667, %v35_v5  ;;  %v34_v9 = vsub.f32 %v28_v7, %v32_v6 }
  0x9f   :  { %122 = vrcp.f32 %v37_v8  ;;  %v36_v10 = vmax.f32 %v34_v9, 1e-05 }
  0xa1   :  { %v38_v11 = vmul.f32 0.06666667, %v36_v10 }
  0xa3   :  { %124 = vrcp.f32 %v38_v11 }
  0xac   :  { %v123_v12 = vpop.eup %122 }
  0xad   :  { %v43_v13 = vmul.f32 %v123_v12, %v30_v2  ;;  %v53_v14 = vmul.f32 %v123_v12, %v23_v0 }
  0xaf   :  { %v88_v15 = vcvt.f32.s32 %v43_v13  ;;  %v104_v17 = vcvt.f32.s32 %v53_v14  ;;  %v86_v20 = vand.u32 2147483647, %v43_v13  ;;  %v91_v24 = vand.u32 2147483648, %v43_v13 }
  0xb0   :  { %v125_v16 = vpop.eup %124  ;;  %v107_v33 = vand.u32 2147483648, %v53_v14  ;;  %v102_v37 = vand.u32 2147483647, %v53_v14 }
  0xb1   :  { %v89_v18 = vcvt.s32.f32 %v88_v15  ;;  %v44_v19 = vmul.f32 %v125_v16, %v32_v6  ;;  %v105_v21 = vcvt.s32.f32 %v104_v17  ;;  %v54_v22 = vmul.f32 %v125_v16, %v24_v1 }
  0xb2   :  { %vm87_vm0 = vcmp.lt.f32.partialorder %v86_v20, 8388608.0  ;;  %vm103_vm2 = vcmp.lt.f32.partialorder %v102_v37, 8388608.0 }
  0xb3   :  { %v90_v23 = vand.u32 2147483647, %v89_v18  ;;  %v96_v25 = vcvt.f32.s32 %v44_v19  ;;  %v112_v26 = vcvt.f32.s32 %v54_v22  ;;  %v106_v28 = vand.u32 2147483647, %v105_v21 }
  0xb4   :  { %v94_v30 = vand.u32 2147483647, %v44_v19  ;;  %v99_v35 = vand.u32 2147483648, %v44_v19  ;;  %v115_v43 = vand.u32 2147483648, %v54_v22  ;;  %v110_v46 = vand.u32 2147483647, %v54_v22 }
  0xb5   :  { %v92_v27 = vor.u32 %v91_v24, %v90_v23  ;;  %v97_v29 = vcvt.s32.f32 %v96_v25  ;;  %v113_v31 = vcvt.s32.f32 %v112_v26  ;;  %v108_v38 = vor.u32 %v107_v33, %v106_v28 }
  0xb6   :  { %vm95_vm1 = vcmp.lt.f32.partialorder %v94_v30, 8388608.0  ;;  %vm111_vm3 = vcmp.lt.f32.partialorder %v110_v46, 8388608.0 }
  0xb7   :  { %v93_v32 = vsel %vm87_vm0, %v92_v27, %v43_v13  ;;  %v98_v34 = vand.u32 2147483647, %v97_v29  ;;  %v114_v40 = vand.u32 2147483647, %v113_v31  ;;  %v109_v47 = vsel %vm103_vm2, %v108_v38, %v53_v14 }
  0xb8   :  { %v47_v36 = vsub.f32 0.0, %v93_v32 }
  0xb9   :  { %v100_v39 = vor.u32 %v99_v35, %v98_v34  ;;  %v116_v48 = vor.u32 %v115_v43, %v114_v40 }
  0xba   :  { %v49_v41 = vmax.f32 %v47_v36, 0.0 }
  0xbb   :  { %v101_v42 = vsel %vm95_vm1, %v100_v39, %v44_v19  ;;  %v117_v53 = vsel %vm111_vm3, %v116_v48, %v54_v22 }
  0xbc   :  { %v51_v44 = vmin.f32 %v49_v41, 15.0  ;;  %v48_v45 = vsub.f32 0.0, %v101_v42 }
  0xbe   :  { %v57_v49 = vadd.f32 %v109_v47, %v51_v44  ;;  %v50_v50 = vmax.f32 %v48_v45, 0.0 }
  0xc0   :  { %v59_v51 = vmax.f32 %v57_v49, 0.0  ;;  %v52_v52 = vmin.f32 %v50_v50, 15.0 }
  0xc2   :  { %v61_v54 = vmin.f32 %v59_v51, 15.0  ;;  %v58_v55 = vadd.f32 %v117_v53, %v52_v52 }
  0xc4   :  { %v63_v56 = vsub.f32 %v61_v54, %v51_v44  ;;  %v60_v57 = vmax.f32 %v58_v55, 0.0 }
  0xc6   :  { %v65_v58 = vmul.f32 %v63_v56, %v37_v8  ;;  %v62_v59 = vmin.f32 %v60_v57, 15.0 }
  0xc8   :  { %67 = vst [vmem:[#allocation5] sm:$0xff] %v65_v58  ;;  %v64_v60 = vsub.f32 %v62_v59, %v52_v52 }
  0xca   :  { %v66_v61 = vmul.f32 %v64_v60, %v38_v11 }
  0xcc   :  { %68 = vst [vmem:[#allocation5 + $0x8] sm:$0xff] %v66_v61 }
  0xcd   :  { %157 = shalt.err (!%p154_p9)
}
  0xce   :  { %80 = dma.vmem_to_hbm [thread:$0]  %s75_s13, 256, %s197_s1, [#allocation4], %s171_s9, %s171_s9, %s172_s10  }
  0xcf   :  { %168 = dma.done.wait [#allocation4], 256  }
  0xd0   :  { %169 = vsyncadd [#allocation4], 4294967040 }
  0xd1   :  { %84 = vsyncpa [#allocation3], 1 }
  0xd2   :  { %85 = vsyncpa [#allocation4], 1 }

</bundles_post_ra>
